<compile_context>
chip_gen: v6e
topology: v6e:2x2x1
jax: 0.10.0
libtpu: 0.0.40
codegen_flags: <defaults>
</compile_context>

<pallas_src>
import jax
import jax.numpy as jnp
import numpy as np
from jax.experimental import pallas as pl
from jax.experimental.pallas import tpu as pltpu

H = W = 7
CIN = 3
CMID = 4
NOUT = 2
P = H * W                  # 49 pixels
K1 = P * CIN               # 147
K2 = P * CMID              # 196
TAU = 1.0                  # F.gumbel_softmax default tau (module's self.temperature unused in forward)
TN_MAX = 4096              # batch tile cap


def _round_up(a, m):
    return ((a + m - 1) // m) * m


def _diffgate_kernel(x_ref, w1_ref, b1_ref, wd_ref, gd_ref, out_ref):
    """One invocation per batch tile: conv-as-matmul + folded linear/softmax."""
    # 1x1 conv (+ bias, ReLU) as one lane-dense MXU matmul: (TN,147) @ (147,196)
    h = jnp.maximum(
        jnp.dot(x_ref[...], w1_ref[...], preferred_element_type=jnp.float32)
        + b1_ref[...],
        0.0)
    # Folded Linear(196,2) + softmax[:, -1]:
    #   d = h . (w2[:,1]-w2[:,0])/tau + (b2[1]-b2[0]+g1-g0)/tau
    # computed as VPU broadcast-multiply + cross-lane reduce (keeps the MXU free
    # for the conv matmul), then sigmoid(d) == softmax(y)[:, -1].
    d = jnp.sum(h * wd_ref[...], axis=-1, keepdims=True) + gd_ref[...]
    out_ref[...] = pl.reciprocal(1.0 + jnp.exp(-d), approx=False)


def prepare_diffgate_params(wc, bc, wl, bl, tau=TAU):
    """One-time host-side weight construction. Reuse the result for every call.

    wc: (4,3) Conv2d(3,4,1) weight (out,in).  bc: (4,).
    wl: (2,196) Linear weight (out, in) over NCHW-flatten order.  bl: (2,).
    """
    inv_tau = 1.0 / tau
    # Block-diagonal conv weight: w1[p*3+c, q*4+m] = (p==q) * wc[m, c]
    w1 = jnp.einsum("pq,mc->pcqm", jnp.eye(P, dtype=jnp.float32), wc).reshape(K1, K2)
    b1 = jnp.tile(bc, P).reshape(1, K2)                       # b1[0, p*4+m] = bc[m]
    # 2-class softmax fold, in the kernel's hidden layout:
    #   wd[0, p*4+m] = (wl[1, m*49+p] - wl[0, m*49+p]) / tau
    wdiff = (wl[1] - wl[0]).reshape(CMID, P)                  # [m, p]
    wd = (jnp.transpose(wdiff, (1, 0)).reshape(1, K2) * inv_tau).astype(jnp.float32)
    bd = ((bl[1] - bl[0]) * inv_tau).astype(jnp.float32)      # scalar
    return w1, b1, wd, bd


@jax.jit
def diffgate_forward(x_nhwc, params, gumbel):
    """x_nhwc: (N,7,7,3) f32 (module input layout). params: prepare_diffgate_params(...).
    gumbel: (N,2) pre-sampled Gumbel(0,1) noise.
    Returns (N,) soft gate probability == gumbel_softmax(logits)[:, -1]."""
    w1, b1, wd, bd = params
    N = x_nhwc.shape[0]

    # Per-call plumbing only (tiny): NHWC flatten (free reshape) + gumbel diff.
    x2 = x_nhwc.reshape(N, K1)                                    # (N,147), index p*3+c
    gd = (gumbel[:, 1:2] - gumbel[:, 0:1]) * (1.0 / TAU) + bd     # (N,1)

    # Batch tiling: big tiles amortise per-step pipeline overhead; cap at
    # ceil(N/2) (rounded to 8) so grid >= 2 and both v7x TensorCores get work.
    if N <= 8:
        TN = N
    else:
        TN = min(TN_MAX, _round_up(pl.cdiv(N, 2), 8))
    grid = (pl.cdiv(N, TN),)

    probs = pl.pallas_call(
        _diffgate_kernel,
        out_shape=jax.ShapeDtypeStruct((N, 1), jnp.float32),
        grid=grid,
        in_specs=[
            pl.BlockSpec((TN, K1), lambda i: (i, 0)),    # x: one batch tile per step
            pl.BlockSpec((K1, K2), lambda i: (0, 0)),    # block-diag conv weight (const)
            pl.BlockSpec((1, K2), lambda i: (0, 0)),     # conv bias (const)
            pl.BlockSpec((1, K2), lambda i: (0, 0)),     # folded linear-diff weight (const)
            pl.BlockSpec((TN, 1), lambda i: (i, 0)),     # gumbel diff per batch tile
        ],
        out_specs=pl.BlockSpec((TN, 1), lambda i: (i, 0)),
        compiler_params=pltpu.CompilerParams(
            dimension_semantics=("parallel",),
            vmem_limit_bytes=48 * 1024 * 1024,
        ),
    )(x2, w1, b1, wd, gd)
    return probs[:, 0]


def _orthogonal(key, rows, cols, std):
    """Deterministic orthogonal init (same semantics as torch.nn.init.orthogonal_)."""
    n, m = max(rows, cols), min(rows, cols)
    a = jax.random.normal(key, (n, m), dtype=jnp.float32)
    q, r = jnp.linalg.qr(a)
    q = q * jnp.sign(jnp.diagonal(r))[None, :]
    if rows < cols:
        q = q.T
    return (std * q).astype(jnp.float32)


def _ref_forward(x, wc, bc, wl, bl, g):
    """Pure-JAX reference mirroring the PyTorch forward (same gumbel noise)."""
    N = x.shape[0]
    xc = jnp.transpose(x, (0, 3, 1, 2))                              # NCHW
    h = jnp.einsum("nchw,oc->nohw", xc, wc) + bc[None, :, None, None]
    h = jnp.maximum(h, 0.0)                                          # (N,4,7,7)
    flat = h.reshape(N, CMID * P)                                    # NCHW flatten
    logits = flat @ wl.T + bl                                        # (N,2); squeeze(-1) is a no-op
    y = jax.nn.softmax((logits + g) / TAU, axis=-1)
    return y[:, -1]


if __name__ == "__main__":
    N = 8
    key = jax.random.PRNGKey(0)
    k_x, k_wc, k_wl, k_g = jax.random.split(key, 4)

    x = jax.random.normal(k_x, (N, H, W, CIN), dtype=jnp.float32)    # NHWC input
    wc = _orthogonal(k_wc, CMID, CIN, float(np.sqrt(2)))             # Conv2d(3,4,1) weight (4,3)
    bc = jnp.zeros((CMID,), jnp.float32)
    wl = _orthogonal(k_wl, NOUT, P * CMID, 1.0)                      # Linear(196,2) weight (2,196)
    bl = jnp.zeros((NOUT,), jnp.float32)
    # TODO(synk): torch's gumbel_softmax draws noise from torch RNG; noise is
    # pre-sampled here with jax.random (no bit-exact RNG match possible).
    g = jax.random.gumbel(k_g, (N, NOUT), dtype=jnp.float32)

    params = prepare_diffgate_params(wc, bc, wl, bl)                 # one-time weight build
    out = jax.block_until_ready(diffgate_forward(x, params, g))

    ref = _ref_forward(x, wc, bc, wl, bl, g)
    np.testing.assert_allclose(np.asarray(out), np.asarray(ref), rtol=1e-5, atol=1e-5)
    print("KERNEL_OK")
</pallas_src>

<mosaic_0001>
module attributes {stable_mosaic.version = 11 : i64} {
  func.func @_diffgate_kernel(%arg0: i32, %arg1: memref<8x147xf32, #tpu.memory_space<vmem>>, %arg2: memref<147x196xf32, #tpu.memory_space<vmem>>, %arg3: memref<1x196xf32, #tpu.memory_space<vmem>>, %arg4: memref<1x196xf32, #tpu.memory_space<vmem>>, %arg5: memref<8x1xf32, #tpu.memory_space<vmem>>, %arg6: memref<8x1xf32, #tpu.memory_space<vmem>>) attributes {dimension_semantics = [#tpu.dimension_semantics<parallel>], iteration_bounds = array<i64: 1>, scalar_prefetch = 0 : i64, scratch_operands = 0 : i64, tpu.core_type = #tpu.core_type<tc>, window_params = [{transform_indices = @transform_0, window_bounds = array<i64: 8, 147>}, {pipeline_mode = #tpu.pipeline_mode<synchronous>, transform_indices = @transform_1, window_bounds = array<i64: 147, 196>}, {pipeline_mode = #tpu.pipeline_mode<synchronous>, transform_indices = @transform_2, window_bounds = array<i64: 1, 196>}, {pipeline_mode = #tpu.pipeline_mode<synchronous>, transform_indices = @transform_3, window_bounds = array<i64: 1, 196>}, {transform_indices = @transform_4, window_bounds = array<i64: 8, 1>}, {transform_indices = @transform_5, window_bounds = array<i64: 8, 1>}]} {
    %c0 = arith.constant 0 : index
    %c0_0 = arith.constant 0 : index
    %0 = vector.load %arg1[%c0, %c0_0] : memref<8x147xf32, #tpu.memory_space<vmem>>, vector<8x147xf32>
    %c0_1 = arith.constant 0 : index
    %c0_2 = arith.constant 0 : index
    %1 = vector.load %arg2[%c0_1, %c0_2] : memref<147x196xf32, #tpu.memory_space<vmem>>, vector<147x196xf32>
    %cst = arith.constant dense<0.000000e+00> : vector<8x196xf32>
    %2 = tpu.matmul %0, %1, %cst {dimension_numbers = #tpu.dot_dimension_numbers<[1], [0], [0], [1], [0, 0, 1, 1], [], []>} : vector<8x147xf32>, vector<147x196xf32>, vector<8x196xf32> -> vector<8x196xf32>
    %c0_3 = arith.constant 0 : index
    %c0_4 = arith.constant 0 : index
    %3 = vector.load %arg3[%c0_3, %c0_4] : memref<1x196xf32, #tpu.memory_space<vmem>>, vector<1x196xf32>
    %4 = vector.broadcast %3 : vector<1x196xf32> to vector<8x196xf32>
    %5 = arith.addf %2, %4 : vector<8x196xf32>
    %cst_5 = arith.constant 0.000000e+00 : f32
    %6 = vector.broadcast %cst_5 : f32 to vector<8x196xf32>
    %7 = arith.maximumf %5, %6 : vector<8x196xf32>
    %c0_6 = arith.constant 0 : index
    %c0_7 = arith.constant 0 : index
    %8 = vector.load %arg4[%c0_6, %c0_7] : memref<1x196xf32, #tpu.memory_space<vmem>>, vector<1x196xf32>
    %9 = vector.broadcast %8 : vector<1x196xf32> to vector<8x196xf32>
    %10 = arith.mulf %7, %9 : vector<8x196xf32>
    %cst_8 = arith.constant dense<0.000000e+00> : vector<8xf32>
    %11 = vector.multi_reduction <add>, %10, %cst_8 [1] : vector<8x196xf32> to vector<8xf32>
    %12 = vector.shape_cast %11 : vector<8xf32> to vector<8x1xf32>
    %c0_9 = arith.constant 0 : index
    %c0_10 = arith.constant 0 : index
    %13 = vector.load %arg5[%c0_9, %c0_10] : memref<8x1xf32, #tpu.memory_space<vmem>>, vector<8x1xf32>
    %14 = arith.addf %12, %13 : vector<8x1xf32>
    %cst_11 = arith.constant 0.000000e+00 : f32
    %15 = vector.broadcast %cst_11 : f32 to vector<8x1xf32>
    %16 = arith.subf %15, %14 : vector<8x1xf32>
    %17 = math.exp %16 : vector<8x1xf32>
    %cst_12 = arith.constant 1.000000e+00 : f32
    %18 = vector.broadcast %cst_12 : f32 to vector<8x1xf32>
    %19 = arith.addf %18, %17 : vector<8x1xf32>
    %20 = tpu.reciprocal %19 : vector<8x1xf32> -> vector<8x1xf32>
    %c0_13 = arith.constant 0 : index
    %c0_14 = arith.constant 0 : index
    %21 = vector.load %arg6[%c0_13, %c0_14] : memref<8x1xf32, #tpu.memory_space<vmem>>, vector<8x1xf32>
    tpu.vector_store %arg6[%c0_13, %c0_14], %20 {strides = array<i32>} : memref<8x1xf32, #tpu.memory_space<vmem>>, vector<8x1xf32>,
    return
  }
  func.func @transform_0(%arg0: i32) -> (i32, i32) {
    %c0_i32 = arith.constant 0 : i32
    %c0_i32_0 = arith.constant 0 : i32
    return %arg0, %c0_i32 : i32, i32
  }
  func.func @transform_1(%arg0: i32) -> (i32, i32) {
    %c0_i32 = arith.constant 0 : i32
    %c0_i32_0 = arith.constant 0 : i32
    %c0_i32_1 = arith.constant 0 : i32
    return %c0_i32, %c0_i32_0 : i32, i32
  }
  func.func @transform_2(%arg0: i32) -> (i32, i32) {
    %c0_i32 = arith.constant 0 : i32
    %c0_i32_0 = arith.constant 0 : i32
    %c0_i32_1 = arith.constant 0 : i32
    return %c0_i32, %c0_i32_0 : i32, i32
  }
  func.func @transform_3(%arg0: i32) -> (i32, i32) {
    %c0_i32 = arith.constant 0 : i32
    %c0_i32_0 = arith.constant 0 : i32
    %c0_i32_1 = arith.constant 0 : i32
    return %c0_i32, %c0_i32_0 : i32, i32
  }
  func.func @transform_4(%arg0: i32) -> (i32, i32) {
    %c0_i32 = arith.constant 0 : i32
    %c0_i32_0 = arith.constant 0 : i32
    return %arg0, %c0_i32 : i32, i32
  }
  func.func @transform_5(%arg0: i32) -> (i32, i32) {
    %c0_i32 = arith.constant 0 : i32
    %c0_i32_0 = arith.constant 0 : i32
    return %arg0, %c0_i32 : i32, i32
  }
}

</mosaic_0001>

<bundles_post_ra>
// kernel: diffgate_forward.1
= control target key start
LH: loop header
LB: loop body
LE: loop exit
PB: predicated region body
PF: predicated region fallthrough
CT: control target
= control target key end

     0   :  { %vm72_vm0 = vcmask 154624   ;;  %vm76_vm1 = vcmask 1042432   ;;  %v62_v40 = vlaneseq  ;;  %vm170_vm2 = vcmask 556032   ;;  %s357_s1 = inlined_call_operand.vmem [shape: f32[147,196], index: 1, kind: input, shape index: {}]   ;;  %s358_s0 = inlined_call_operand.vmem [shape: f32[8,147], index: 0, kind: input, shape index: {}]   ;;  %s359_s2 = inlined_call_operand.vmem [shape: f32[1,196], index: 2, kind: input, shape index: {}]   ;;  %s360_s3 = inlined_call_operand.vmem [shape: f32[1,196], index: 3, kind: input, shape index: {}]   ;;  %s361_s4 = inlined_call_operand.vmem [shape: f32[8,1], index: 4, kind: input, shape index: {}]   ;;  %s362_s5 = inlined_call_operand.vmem [shape: f32[8,1], index: 5, kind: output, shape index: {}]  }
   0x1   :  { %v53_v0 = vld [vmem:[%s357_s1 + $0xf8] sm:$0xff]  ;;  %v52_v1 = vld [vmem:[%s357_s1 + $0xf0] sm:$0xff]  ;;  %v51_v2 = vld [vmem:[%s357_s1 + $0xe8] sm:$0xff]  ;;  %vm182_vm3 = vcmask 7168  }
   0x2   :  { %83 = vmatprep.subr.mxu0 %v53_v0  ;;  %v50_v3 = vld [vmem:[%s357_s1 + $0xe0] sm:$0xff]  ;;  %v49_v4 = vld [vmem:[%s357_s1 + $0xd8] sm:$0xff]  ;;  %v48_v5 = vld [vmem:[%s357_s1 + $0xd0] sm:$0xff]  ;;  %v63_v41 = vshrl.u32 %v62_v40, 7 }
   0x3   :  { %84 = vmatpush1.msra.mxu0 %v52_v1  ;;  %v47_v6 = vld [vmem:[%s357_s1 + $0xc8] sm:$0xff]  ;;  %v46_v7 = vld [vmem:[%s357_s1 + $0xc0] sm:$0xff]  ;;  %v45_v8 = vld [vmem:[%s357_s1 + $0xb8] sm:$0xff] }
   0x4   :  { %85 = vmatprep.subr.mxu0 %v51_v2  ;;  %v44_v9 = vld [vmem:[%s357_s1 + $0xb0] sm:$0xff]  ;;  %v43_v10 = vld [vmem:[%s357_s1 + $0xa8] sm:$0xff]  ;;  %v42_v11 = vld [vmem:[%s357_s1 + $0xa0] sm:$0xff]  ;;  %v64_v42 = vsub.s32 0, %v63_v41  ;;  %v68_v44 = vsub.s32 1, %v63_v41 }
   0x5   :  { %86 = vmatpush1.msra.mxu0 %v50_v3  ;;  %v41_v12 = vld [vmem:[%s357_s1 + $0x98] sm:$0xff]  ;;  %v40_v13 = vld [vmem:[%s357_s1 + $0x90] sm:$0xff]  ;;  %v39_v14 = vld [vmem:[%s357_s1 + $0x88] sm:$0xff] }
   0x6   :  { %87 = vmatprep.subr.mxu0 %v49_v4  ;;  %v21_v15 = vld [vmem:[%s358_s0 + $0x8] sm:$0xff]  ;;  %v38_v16 = vld [vmem:[%s357_s1 + $0x80] sm:$0xff]  ;;  %v37_v17 = vld [vmem:[%s357_s1 + $0x78] sm:$0xff] }
   0x7   :  { %88 = vmatpush1.msra.mxu0 %v48_v5  ;;  %190 = vmatprep.mubr.msk.f32.mxu0 %vm72_vm0, %v21_v15  ;;  %v36_v18 = vld [vmem:[%s357_s1 + $0x70] sm:$0xff]  ;;  %v35_v19 = vld [vmem:[%s357_s1 + $0x68] sm:$0xff]  ;;  %v34_v20 = vld [vmem:[%s357_s1 + $0x60] sm:$0xff] }
   0x8   :  { %89 = vmatprep.subr.mxu0 %v47_v6  ;;  %v33_v21 = vld [vmem:[%s357_s1 + $0x58] sm:$0xff]  ;;  %v32_v22 = vld [vmem:[%s357_s1 + $0x50] sm:$0xff]  ;;  %v31_v23 = vld [vmem:[%s357_s1 + $0x48] sm:$0xff] }
   0x9   :  { %90 = vmatpush1.msra.mxu0 %v46_v7  ;;  %v30_v24 = vld [vmem:[%s357_s1 + $0x40] sm:$0xff]  ;;  %v29_v25 = vld [vmem:[%s357_s1 + $0x38] sm:$0xff]  ;;  %v28_v26 = vld [vmem:[%s357_s1 + $0x30] sm:$0xff] }
   0xa   :  { %91 = vmatprep.subr.mxu0 %v45_v8  ;;  %v27_v27 = vld [vmem:[%s357_s1 + $0x28] sm:$0xff]  ;;  %v26_v28 = vld [vmem:[%s357_s1 + $0x20] sm:$0xff]  ;;  %v25_v29 = vld [vmem:[%s357_s1 + $0x18] sm:$0xff] }
   0xb   :  { %92 = vmatpush1.msra.mxu0 %v44_v9  ;;  %v24_v30 = vld [vmem:[%s357_s1 + $0x10] sm:$0xff]  ;;  %v23_v31 = vld [vmem:[%s357_s1 + $0x8] sm:$0xff]  ;;  %v22_v32 = vld [vmem:[%s357_s1] sm:$0xff] }
   0xc   :  { %93 = vmatprep.subr.mxu0 %v43_v10  ;;  %v59_v33 = vld [vmem:[%s357_s1 + $0x128] sm:$0x7]  ;;  %v58_v34 = vld [vmem:[%s357_s1 + $0x120] sm:$0x7]  ;;  %v57_v35 = vld [vmem:[%s357_s1 + $0x118] sm:$0xff] }
   0xd   :  { %94 = vmatpush1.msra.mxu0 %v42_v11  ;;  %v56_v36 = vld [vmem:[%s357_s1 + $0x110] sm:$0xff]  ;;  %v55_v37 = vld [vmem:[%s357_s1 + $0x108] sm:$0xff]  ;;  %v54_v38 = vld [vmem:[%s357_s1 + $0x100] sm:$0xff] }
   0xe   :  { %95 = vmatprep.subr.mxu0 %v41_v12  ;;  %v20_v39 = vld [vmem:[%s358_s0] sm:$0xff] }
   0xf   :  { %96 = vmatpush1.msra.mxu0 %v40_v13  ;;  %v60_v43 = vld [vmem:[%s359_s2] sm:$0x3] }
  0x10   :  { %97 = vmatprep.subr.mxu0 %v39_v14  ;;  %v65_v45 = vrot.slane %v60_v43, %v64_v42  ;;  %v69_v46 = vrot.slane %v60_v43, %v68_v44  ;;  %v156_v49 = vld [vmem:[%s360_s3] sm:$0x3] }
  0x11   :  { %98 = vmatpush1.msra.mxu0 %v38_v16  ;;  %v165_v52 = vrot.slane %v156_v49, %v68_v44  ;;  %v161_v54 = vrot.slane %v156_v49, %v64_v42  ;;  %v175_v60 = vld [vmem:[%s361_s4] sm:$0xff] }
  0x12   :  { %99 = vmatprep.subr.mxu0 %v37_v17 }
  0x13   :  { %100 = vmatpush1.msra.mxu0 %v36_v18 }
  0x14   :  { %101 = vmatprep.subr.mxu0 %v35_v19 }
  0x15   :  { %102 = vmatpush1.msra.mxu0 %v34_v20 }
  0x16   :  { %103 = vmatprep.subr.mxu0 %v33_v21 }
  0x17   :  { %104 = vmatpush1.msra.mxu0 %v32_v22 }
  0x18   :  { %105 = vmatprep.subr.mxu0 %v31_v23 }
  0x19   :  { %106 = vmatpush1.msra.mxu0 %v30_v24 }
  0x1a   :  { %107 = vmatprep.subr.mxu0 %v29_v25 }
  0x1b   :  { %108 = vmatpush1.msra.mxu0 %v28_v26 }
  0x1c   :  { %109 = vmatprep.subr.mxu0 %v27_v27 }
  0x1d   :  { %110 = vmatpush1.msra.mxu0 %v26_v28 }
  0x1e   :  { %111 = vmatprep.subr.mxu0 %v25_v29 }
  0x1f   :  { %112 = vmatpush1.msra.mxu0 %v24_v30 }
  0x20   :  { %113 = vmatprep.subr.mxu0 %v23_v31 }
  0x21   :  { %114 = vmatpush1.msra.mxu0 %v22_v32 }
  0x22   :  { %188 = vmatprep.subr.msk.mxu0 %vm76_vm1, %v59_v33 }
  0x23   :  { %189 = vmatpush2.msk.msra.mxu0 %vm76_vm1, %v58_v34 }
  0x24   :  { %143 = vmatprep.subr.mxu0 %v57_v35 }
  0x25   :  { %144 = vmatpush2.msra.mxu0 %v56_v36 }
  0x26   :  { %145 = vmatprep.subr.mxu0 %v55_v37 }
  0x27   :  { %146 = vmatpush2.msra.mxu0 %v54_v38 }
  0x28   :  { %148 = vmatmul.mubr.f32.vlgmr.msra.gmra.mxu0 %v20_v39 }
  0xe8   :  { %v149_v47 = vpop.f32.mrf.mxu0 }
  0xe9   :  { %v150_v48 = vadd.f32 %v149_v47, %v65_v45 }
  0xea   :  { %v151_v50 = vpop.f32.mrf.mxu0 }
  0xeb   :  { %v152_v51 = vadd.f32 %v151_v50, %v69_v46  ;;  %v154_v53 = vmax.f32 %v150_v48, 0.0 }
  0xed   :  { %v155_v55 = vmax.f32 %v152_v51, 0.0  ;;  %v168_v57 = vmul.f32 %v161_v54, %v154_v53 }
  0xef   :  { %v169_v56 = vmul.f32 %v165_v52, %v155_v55 }
  0xf1   :  { %v171_v58 = vsel %vm170_vm2, %v169_v56, 0.0 }
  0xf2   :  { %v172_v59 = vadd.f32 %v171_v58, %v168_v57 }
  0xf4   :  { %173 = vadd.xlane.f32.xlu0 %v172_v59 }
 0x17d   :  { %v174_v61 = vpop.xlane.xlu0 %173 }
 0x17e   :  { %v176_v62 = vadd.f32 %v175_v60, %v174_v61 }
 0x180   :  { %v177_v63 = vsub.f32 0.0, %v176_v62 }
 0x182   :  { %v178_v0 = vmul.f32 1.442695, %v177_v63 }
 0x184   :  { %191 = vpow2.f32 %v178_v0 }
 0x191   :  { %v192_v1 = vpop.eup %191 }
 0x192   :  { %v180_v2 = vadd.f32 1.0, %v192_v1 }
 0x194   :  { %193 = vrcp.f32 %v180_v2 }
 0x1a1   :  { %v194_v3 = vpop.eup %193 }
 0x1a2   :  { %183 = vst.msk [vmem:[%s362_s5] sm:$0xff] %vm182_vm3, %v194_v3 }

</bundles_post_ra>
